<compile_context>
chip_gen: v7x
topology: tpu7x:2x2x1
jax: 0.10.0
libtpu: 0.0.40
codegen_flags: <defaults>
</compile_context>

<pallas_src>
import functools

import jax
import jax.numpy as jnp
from jax.experimental import pallas as pl
from jax.experimental.pallas import tpu as pltpu


def _round_up(x, m):
    return (x + m - 1) // m * m


def _focal_loss_kernel(x_ref, t_ref, out_ref, *, num_classes, gamma, alpha):
    # x_ref: (C, TN) logits, classes on sublanes / rows on lanes.
    # t_ref: (1, TN) int32 labels.   out_ref: (1, TN) float32 per-row loss.
    x = x_ref[...].astype(jnp.float32)
    t = jnp.clip(t_ref[...].astype(jnp.int32), 0, num_classes - 1)        # (1, TN)

    c, tn = x.shape
    cls = jax.lax.broadcasted_iota(jnp.int32, (c, tn), 0)                 # class id per sublane

    # log-softmax over the class (sublane) axis.  exp(shifted) is the only
    # full-size EUP op and is reused to recover prob (no second exp, no pow).
    m = jnp.max(x, axis=0, keepdims=True)                                 # (1, TN)
    shifted = x - m                                                       # (C, TN)
    e = jnp.exp(shifted)                                                  # (C, TN)
    s = jnp.sum(e, axis=0, keepdims=True)                                 # (1, TN)
    log_s = jnp.log(s)                                                    # (1, TN)
    neg_lp = log_s - shifted                                              # (C, TN) = -log_prob
    p = e * (1.0 / s)                                                     # (C, TN) prob

    # Smoothed one-hot weights (<= 3 nonzero classes per row), built directly
    # in the dense layout; each compare/select only touches ceil(C/8) sublane
    # tiles per 128 rows.
    if num_classes == 2:
        w = (jnp.where(cls == t, 0.95, 0.0)
             + jnp.where(cls == (1 - t), 0.05, 0.0))
    else:
        t0 = jnp.clip(t - 1, 0, num_classes - 1)
        t1 = jnp.clip(t + 1, 0, num_classes - 1)
        w = (jnp.where(cls == t, 0.9, 0.0)
             + jnp.where(cls == t0, 0.05, 0.0)
             + jnp.where(cls == t1, 0.05, 0.0))

    g = float(gamma)
    if g.is_integer() and 0.0 <= g <= 16.0:
        gi = int(g)
        q = 1.0 - p
        f = jnp.ones_like(p) if gi == 0 else q
        for _ in range(max(gi - 1, 0)):
            f = f * q                                                     # VALU, not EUP pow
    else:
        # Clamped exp/log form: keeps zero-weight classes finite (no NaN into
        # the class sum) and lowers to plain EUP exp/log.
        q = jnp.maximum(1.0 - p, jnp.float32(jnp.finfo(jnp.float32).tiny))
        f = jnp.exp(g * jnp.log(q))

    loss = w * neg_lp * f                                                 # (C, TN)
    out_ref[...] = (alpha * jnp.sum(loss, axis=0, keepdims=True)).astype(out_ref.dtype)


def _choose_tile_cols(n, c, in_itemsize, *, max_tile_cols=4096,
                      vmem_budget_bytes=16 * 1024 * 1024):
    if n <= 128:
        return n  # block == whole (tiny) array; lane dim may equal the full dim
    c_sub = _round_up(max(c, 1), 8)
    # Per tile column: double-buffered native-dtype input block + ~8 live f32
    # (C_pad, TN) intermediates (sublane-padded) + small (1, TN) temps.
    bytes_per_col = 2 * c * in_itemsize + 8 * c_sub * 4 + 64
    cap = max(128, (vmem_budget_bytes // bytes_per_col) // 128 * 128)
    tn = min(max_tile_cols, cap, (n // 128) * 128)   # never wider than the array
    # Keep >= 2 grid steps when a single tile would cover everything: v7x has
    # two TensorCores and "parallel" sharding needs > 1 grid step to use both.
    if n > 256 and tn >= _round_up(n, 128):
        tn = max(128, _round_up(pl.cdiv(n, 2), 128))
    return tn


def focal_loss(logits, target, *, num_classes, gamma=2.0, alpha=1.0,
               max_tile_cols=4096):
    """logits: (..., C) float (f32 or bf16); target: (...,) integer labels.

    Returns float32 loss of shape logits.shape[:-1] (matches the PyTorch module).
    """
    *lead, c = logits.shape
    assert c == num_classes, "class dim must equal num_classes"
    n = 1
    for d in lead:
        n *= int(d)

    # Class-major view: rows on the 128-lane axis, classes on sublanes.  For
    # small C this single relayout buys ~128/C x denser vector work in-kernel.
    x_t = logits.reshape(n, c).T                       # (C, N)
    t_row = target.reshape(1, n).astype(jnp.int32)     # (1, N)

    tn = _choose_tile_cols(n, c, jnp.dtype(logits.dtype).itemsize,
                           max_tile_cols=max_tile_cols)
    grid = pl.cdiv(n, tn)

    kernel = functools.partial(
        _focal_loss_kernel,
        num_classes=num_classes,
        gamma=float(gamma),
        alpha=float(alpha),
    )

    out = pl.pallas_call(
        kernel,
        out_shape=jax.ShapeDtypeStruct((1, n), jnp.float32),
        grid_spec=pltpu.PrefetchScalarGridSpec(
            num_scalar_prefetch=0,
            grid=(grid,),
            in_specs=[
                pl.BlockSpec((c, tn), lambda i: (0, i)),   # logits tile (native dtype)
                pl.BlockSpec((1, tn), lambda i: (0, i)),   # labels tile
            ],
            out_specs=pl.BlockSpec((1, tn), lambda i: (0, i)),
        ),
        compiler_params=pltpu.CompilerParams(
            dimension_semantics=("parallel",),
            vmem_limit_bytes=32 * 1024 * 1024,
        ),
    )(x_t, t_row)

    return out.reshape(tuple(lead))


def _reference_focal_loss(logits, target, *, num_classes, gamma=2.0, alpha=1.0):
    # Pure-JAX reference mirroring the PyTorch module, for verification.
    t = jnp.clip(target, 0, num_classes - 1)
    if num_classes == 2:
        nt = 0.95 * jax.nn.one_hot(t, num_classes) + 0.05 * jax.nn.one_hot(1 - t, num_classes)
    else:
        nt = 0.9 * jax.nn.one_hot(t, num_classes)
        nt += 0.05 * jax.nn.one_hot(jnp.clip(t - 1, 0, num_classes - 1), num_classes)
        nt += 0.05 * jax.nn.one_hot(jnp.clip(t + 1, 0, num_classes - 1), num_classes)
    log_prob = jax.nn.log_softmax(logits.astype(jnp.float32), axis=-1)
    prob = jnp.exp(log_prob)
    loss = -nt * log_prob * (1.0 - prob) ** gamma
    return alpha * loss.sum(axis=-1)


if __name__ == "__main__":
    key = jax.random.PRNGKey(0)

    def run_case(n, num_classes, gamma, alpha, case_key):
        k_logits, k_target = jax.random.split(case_key)
        logits = jax.random.normal(k_logits, (n, num_classes), dtype=jnp.float32)
        target = jax.random.randint(k_target, (n,), 0, num_classes, dtype=jnp.int32)
        out = jax.block_until_ready(
            focal_loss(logits, target, num_classes=num_classes, gamma=gamma, alpha=alpha))
        ref = _reference_focal_loss(
            logits, target, num_classes=num_classes, gamma=gamma, alpha=alpha)
        assert out.shape == (n,)
        assert bool(jnp.allclose(out, ref, atol=2e-5, rtol=2e-5)), \
            f"mismatch vs reference (n={n}, C={num_classes}, gamma={gamma})"

    keys = jax.random.split(key, 3)
    run_case(300, 10, 2.0, 1.0, keys[0])   # 2 grid steps + partial tail block (no padding)
    run_case(40, 2, 2.0, 0.5, keys[1])     # binary smoothing branch, sub-128-lane block
    run_case(130, 10, 1.5, 1.0, keys[2])   # non-integer gamma path + partial tail

    print("KERNEL_OK")
</pallas_src>

<mosaic_0001>
module attributes {stable_mosaic.version = 11 : i64} {
  func.func @_focal_loss_kernel(%arg0: i32, %arg1: memref<10x256xf32, #tpu.memory_space<vmem>>, %arg2: memref<1x256xi32, #tpu.memory_space<vmem>>, %arg3: memref<1x256xf32, #tpu.memory_space<vmem>>) attributes {dimension_semantics = [#tpu.dimension_semantics<parallel>], iteration_bounds = array<i64: 2>, scalar_prefetch = 0 : i64, scratch_operands = 0 : i64, tpu.core_type = #tpu.core_type<tc>, window_params = [{transform_indices = @transform_0, window_bounds = array<i64: 10, 256>}, {transform_indices = @transform_1, window_bounds = array<i64: 1, 256>}, {transform_indices = @transform_2, window_bounds = array<i64: 1, 256>}]} {
    %c0 = arith.constant 0 : index
    %c0_0 = arith.constant 0 : index
    %0 = vector.load %arg1[%c0, %c0_0] : memref<10x256xf32, #tpu.memory_space<vmem>>, vector<10x256xf32>
    %c0_1 = arith.constant 0 : index
    %c0_2 = arith.constant 0 : index
    %1 = vector.load %arg2[%c0_1, %c0_2] : memref<1x256xi32, #tpu.memory_space<vmem>>, vector<1x256xi32>
    %c0_i32 = arith.constant 0 : i32
    %c9_i32 = arith.constant 9 : i32
    %2 = vector.broadcast %c0_i32 : i32 to vector<1x256xi32>
    %3 = arith.maxsi %2, %1 : vector<1x256xi32>
    %4 = vector.broadcast %c9_i32 : i32 to vector<1x256xi32>
    %5 = arith.minsi %4, %3 : vector<1x256xi32>
    %6 = tpu.iota {dimensions = array<i32: 0>} : vector<10x256xi32>
    %cst = arith.constant dense<0xFF800000> : vector<256xf32>
    %7 = vector.multi_reduction <maximumf>, %0, %cst [0] : vector<10x256xf32> to vector<256xf32>
    %8 = vector.shape_cast %7 : vector<256xf32> to vector<1x256xf32>
    %9 = vector.broadcast %8 : vector<1x256xf32> to vector<10x256xf32>
    %10 = arith.subf %0, %9 : vector<10x256xf32>
    %11 = math.exp %10 : vector<10x256xf32>
    %cst_3 = arith.constant dense<0.000000e+00> : vector<256xf32>
    %12 = vector.multi_reduction <add>, %11, %cst_3 [0] : vector<10x256xf32> to vector<256xf32>
    %13 = vector.shape_cast %12 : vector<256xf32> to vector<1x256xf32>
    %14 = math.log %13 : vector<1x256xf32>
    %15 = vector.broadcast %14 : vector<1x256xf32> to vector<10x256xf32>
    %16 = arith.subf %15, %10 : vector<10x256xf32>
    %cst_4 = arith.constant 1.000000e+00 : f32
    %17 = vector.broadcast %cst_4 : f32 to vector<1x256xf32>
    %18 = arith.divf %17, %13 : vector<1x256xf32>
    %19 = vector.broadcast %18 : vector<1x256xf32> to vector<10x256xf32>
    %20 = arith.mulf %11, %19 : vector<10x256xf32>
    %c1_i32 = arith.constant 1 : i32
    %21 = vector.broadcast %c1_i32 : i32 to vector<1x256xi32>
    %22 = arith.subi %5, %21 : vector<1x256xi32>
    %c0_i32_5 = arith.constant 0 : i32
    %c9_i32_6 = arith.constant 9 : i32
    %23 = vector.broadcast %c0_i32_5 : i32 to vector<1x256xi32>
    %24 = arith.maxsi %23, %22 : vector<1x256xi32>
    %25 = vector.broadcast %c9_i32_6 : i32 to vector<1x256xi32>
    %26 = arith.minsi %25, %24 : vector<1x256xi32>
    %c1_i32_7 = arith.constant 1 : i32
    %27 = vector.broadcast %c1_i32_7 : i32 to vector<1x256xi32>
    %28 = arith.addi %5, %27 : vector<1x256xi32>
    %c0_i32_8 = arith.constant 0 : i32
    %c9_i32_9 = arith.constant 9 : i32
    %29 = vector.broadcast %c0_i32_8 : i32 to vector<1x256xi32>
    %30 = arith.maxsi %29, %28 : vector<1x256xi32>
    %31 = vector.broadcast %c9_i32_9 : i32 to vector<1x256xi32>
    %32 = arith.minsi %31, %30 : vector<1x256xi32>
    %33 = vector.broadcast %5 : vector<1x256xi32> to vector<10x256xi32>
    %34 = arith.cmpi eq, %6, %33 : vector<10x256xi32>
    %cst_10 = arith.constant 0.899999976 : f32
    %cst_11 = arith.constant 0.000000e+00 : f32
    %35 = vector.broadcast %cst_10 : f32 to vector<10x256xf32>
    %36 = vector.broadcast %cst_11 : f32 to vector<10x256xf32>
    %37 = arith.select %34, %35, %36 : vector<10x256xi1>, vector<10x256xf32>
    %38 = vector.broadcast %26 : vector<1x256xi32> to vector<10x256xi32>
    %39 = arith.cmpi eq, %6, %38 : vector<10x256xi32>
    %cst_12 = arith.constant 5.000000e-02 : f32
    %cst_13 = arith.constant 0.000000e+00 : f32
    %40 = vector.broadcast %cst_12 : f32 to vector<10x256xf32>
    %41 = vector.broadcast %cst_13 : f32 to vector<10x256xf32>
    %42 = arith.select %39, %40, %41 : vector<10x256xi1>, vector<10x256xf32>
    %43 = arith.addf %37, %42 : vector<10x256xf32>
    %44 = vector.broadcast %32 : vector<1x256xi32> to vector<10x256xi32>
    %45 = arith.cmpi eq, %6, %44 : vector<10x256xi32>
    %cst_14 = arith.constant 5.000000e-02 : f32
    %cst_15 = arith.constant 0.000000e+00 : f32
    %46 = vector.broadcast %cst_14 : f32 to vector<10x256xf32>
    %47 = vector.broadcast %cst_15 : f32 to vector<10x256xf32>
    %48 = arith.select %45, %46, %47 : vector<10x256xi1>, vector<10x256xf32>
    %49 = arith.addf %43, %48 : vector<10x256xf32>
    %cst_16 = arith.constant 1.000000e+00 : f32
    %50 = vector.broadcast %cst_16 : f32 to vector<10x256xf32>
    %51 = arith.subf %50, %20 : vector<10x256xf32>
    %52 = arith.mulf %51, %51 : vector<10x256xf32>
    %53 = arith.mulf %49, %16 : vector<10x256xf32>
    %54 = arith.mulf %53, %52 : vector<10x256xf32>
    %cst_17 = arith.constant dense<0.000000e+00> : vector<256xf32>
    %55 = vector.multi_reduction <add>, %54, %cst_17 [0] : vector<10x256xf32> to vector<256xf32>
    %56 = vector.shape_cast %55 : vector<256xf32> to vector<1x256xf32>
    %cst_18 = arith.constant 1.000000e+00 : f32
    %57 = vector.broadcast %cst_18 : f32 to vector<1x256xf32>
    %58 = arith.mulf %57, %56 : vector<1x256xf32>
    %c0_19 = arith.constant 0 : index
    %c0_20 = arith.constant 0 : index
    %59 = vector.load %arg3[%c0_19, %c0_20] : memref<1x256xf32, #tpu.memory_space<vmem>>, vector<1x256xf32>
    tpu.vector_store %arg3[%c0_19, %c0_20], %58 {strides = array<i32>} : memref<1x256xf32, #tpu.memory_space<vmem>>, vector<1x256xf32>,
    return
  }
  func.func @transform_0(%arg0: i32) -> (i32, i32) {
    %c0_i32 = arith.constant 0 : i32
    %c0_i32_0 = arith.constant 0 : i32
    return %c0_i32, %arg0 : i32, i32
  }
  func.func @transform_1(%arg0: i32) -> (i32, i32) {
    %c0_i32 = arith.constant 0 : i32
    %c0_i32_0 = arith.constant 0 : i32
    return %c0_i32, %arg0 : i32, i32
  }
  func.func @transform_2(%arg0: i32) -> (i32, i32) {
    %c0_i32 = arith.constant 0 : i32
    %c0_i32_0 = arith.constant 0 : i32
    return %c0_i32, %arg0 : i32, i32
  }
}

</mosaic_0001>

<bundles_post_ra>
// kernel: tpu_custom_call.1
= control target key start
LH: loop header
LB: loop body
LE: loop exit
PB: predicated region body
PF: predicated region fallthrough
CT: control target
= control target key end

     0   :  { %7 = vsyncpa [#allocation3], 0  ;;  %s945_s0 = inlined_call_operand.hbm [shape: f32[10,300], index: 0, kind: input, shape index: {}]   ;;  %s946_s1 = inlined_call_operand.vmem [shape: s32[1,300], index: 1, kind: input, shape index: {}]   ;;  %s947_s2 = inlined_call_operand.hbm [shape: f32[1,300], index: 2, kind: output, shape index: {}]  }
   0x1   :  { %9 = vsyncpa [#allocation3 + $0x1], 0 }
   0x2   :  { %10 = vsyncpa [#allocation4], 0 }
   0x3   :  { %12 = vsyncpa [#allocation4 + $0x1], 0  ;;  %s714_s9 = smov 0   ;;  %s716_s10 = smov 0  }
   0x4   :  { %s718_s11 = smov 0   ;;  %s720_s12 = smov 0  }
   0x5 LB: > { %s735_s13 = sadd.s32 4294967295, %s691_s12   ;;  %s511_s14 = sadd.s32 4294967294, %s691_s12   ;;  %s691_s12 = sphi %s720_s12, %s957_s12   ;;  %s687_s11 = sphi %s718_s11, %s956_s11   ;;  %s683_s10 = sphi %s716_s10, %s955_s10   ;;  %s679_s9 = sphi %s714_s9, %s954_s9  }
   0x6   : > { %s739_s15 = sadd.s32 1, %s691_s12   ;;  %s25_s16 = sadd.s32 1, %s687_s11 }
   0x7   : > { %s22_s17 = ssub.s32 %s691_s12, %s739_s15  ;;  %p32_p0 = scmp.ne.s32.totalorder %s687_s11, %s683_s10 }
   0x8   : > { %p23_p1 = scmp.eq.s32.totalorder %s22_s17, 0  ;;  %p33_p2 = scmp.eq.s32.totalorder %s691_s12, 0 }
   0x9   : > { %p38_p3 = scmp.ne.s32.totalorder %s683_s10, %s679_s9  ;;  %p39_p4 = scmp.eq.s32.totalorder %s735_s13, 0 }
   0xa   : > { %s751_s18 = scalar_select %p23_p1, %s687_s11, %s25_s16  }
   0xb   : > { %p34_p5 = por %p33_p2, %p32_p0  ;;  %p753_p6 = por %p39_p4, %p38_p3 }
   0xc   : > { %p88_p7 = scmp.eq.s32.totalorder %s735_s13, 1  ;;  %p94_p8 = scmp.eq.s32.totalorder %s511_s14, 1 }
   0xd   : > { %p948_p11 = scmp.ge.s32.totalorder %s691_s12, 2 }
   0xe   : > { %p758_p9 = por %p88_p7, %p32_p0  ;;  %p762_p10 = por %p94_p8, %p38_p3 }
   0xf   : > { %110 = sbr.rel (%p948_p11) target bundleno = 57 (0x39), region = 16 }
  0x10   : > { %s951_s21 = scalar_select %p762_p10, 1, 0 }
  0x16   : > { %113 = sbr.rel (!%p34_p5) target bundleno = 57 (0x39), region = 20  ;;  %s114_s22 = sand.u32 (%p34_p5), 1, %s687_s11  }
  0x17   : > { %s515_s23 = sshll.u32 (%p34_p5), %s691_s12, 1  ;;  %s514_s24 = sshll.u32 (%p34_p5), %s114_s22, 5 }
  0x18   : > { %s120_s25 = ssub.s32 (%p34_p5), 3, %s515_s23  ;;  %s777_s28 = scalar_lea.sflag (%p34_p5), [#allocation3], %s114_s22 }
  0x19   : > { %p121_p12 = scmp.lt.s32.totalorder (%p34_p5), %s120_s25, 2  ;;  %s118_s29 = scalar_lea.vmem (%p34_p5), [#allocation2], %s514_s24 }
  0x1d   : > { %s959_s25 = smov (!%p121_p12, %s120_s25), 2 }
  0x1e   : > { %s774_s26 = sshll.u32 %s959_s25, 8 }
  0x1f   : > { %s125_s27 = ssub.s32 512, %s774_s26 }
  0x20   : > { %126 = vsyncadd %s777_s28, %s125_s27  ;;  %p517_p13 = scmp.ne.s32.totalorder %s774_s26, 0  ;;  %s534_s30 = sshll.u32 %s691_s12, 8 }
  0x21   : > { %s785_s5 = scalar_lea.hbm %s945_s0, %s534_s30  ;;  %s519_s6 = sshll.u32 %s959_s25, 3 }
  0x22   : > { %s132_s7 = sshll.u32 %s118_s29, 4  ;;  %s597_s8 = scalar_lea.hbm %s785_s5, %s774_s26  ;;  %s788_s7 = int_to_ptr.vmem [resolvable:$true] %s132_s7 }
  0x23   : > { %p598_p0 = scmp.ne.s32.totalorder %s785_s5, %s597_s8  ;;  %s601_s17 = scalar_lea.hbm %s945_s0, 768 }
  0x24   : > { %p602_p3 = scmp.lt.u32.totalorder %s785_s5, %s945_s0  ;;  %p603_p4 = scmp.lt.u32.totalorder %s601_s17, %s597_s8 }
  0x25   : > { %p599_p1 = pnand %p598_p0, %p517_p13  ;;  %p605_p7 = scmp.lt.u32.totalorder %s597_s8, %s785_s5 }
  0x26   : > { %p604_p5 = por %p603_p4, %p602_p3 }
  0x27   : > { %p600_p2 = pneg %p599_p1 }
  0x28   : > { %p606_p8 = por %p605_p7, %p604_p5 }
  0x2a   : > { %p607_p12 = pnand %p606_p8, %p600_p2 }
  0x2c   : > { %610 = shalt.err (!%p607_p12)
}
  0x2d   : > { %s611_s24 = scalar_lea.vmem %s788_s7, %s774_s26  ;;  %s693_s27 = smov [#allocation2]  }
  0x2e   : > { %p612_p0 = scmp.ne.s32.totalorder %s788_s7, %s611_s24  ;;  %s615_s29 = sshll.u32 %s693_s27, 4  ;;  %s616_s29 = int_to_ptr.vmem [resolvable:$false] %s615_s29 }
  0x2f   : > { %s617_s30 = scalar_lea.vmem %s616_s29, 1024  ;;  %p618_p10 = scmp.lt.s32.totalorder %s788_s7, %s616_s29 }
  0x30   : > { %p613_p1 = pnand %p612_p0, %p517_p13  ;;  %p619_p3 = scmp.lt.s32.totalorder %s617_s30, %s611_s24 }
  0x32   : > { %p614_p11 = pneg %p613_p1  ;;  %p620_p4 = por %p619_p3, %p618_p10 }
  0x34   : > { %p621_p5 = pnand %p620_p4, %p614_p11 }
  0x36   : > { %624 = shalt.err (!%p621_p5)
}
  0x37   : > { %s694_s3 = smov 384   ;;  %s695_s4 = smov 256  }
  0x38   : > { %138 = dma.hbm_to_vmem [thread:$0]  (%p517_p13), %s785_s5, %s774_s26, %s788_s7, %s777_s28, %s694_s3, %s695_s4, %s519_s6  }
  0x39 PF: > { %p522_p2 = scmp.ge.s32.totalorder %s691_s12, 1  ;;  %p156_p7 = scmp.lt.s32.totalorder %s691_s12, 3 }
  0x3b   : > { %p157_p10 = pnand %p522_p2, %p156_p7 }
  0x3c   : > { %s820_s8 = sand.u32 (!%p157_p10), 1, %s683_s10  }
  0x3d   : > { %160 = sbr.rel (%p157_p10) target bundleno = 189 (0xbd), region = 28  ;;  %s523_s14 = sshll.u32 (!%p157_p10), %s820_s8, 5 }
  0x3e   : > { %s163_s16 = scalar_lea.sflag (!%p157_p10), [#allocation3], %s820_s8  ;;  %s166_s17 = scalar_lea.vmem (!%p157_p10), [#allocation2], %s523_s14 }
  0x44   : > { %670 = dma.done.wait (%p753_p6), %s163_s16, 512  }
  0x45   : > { %672 = vsyncadd (%p753_p6), %s163_s16, 4294966784  ;;  %vm230_vm0 = vcmask 1041408   ;;  %s829_s25 = sshll.u32 %s735_s13, 1  ;;  %v218_v0 = vld [vmem:[%s166_s17] sm:$0xff]  ;;  %v219_v1 = vld [vmem:[%s166_s17 + $0x8] sm:$0xff]  ;;  %v227_v34 = vlaneseq  ;;  %s524_s6 = sshll.u32 %s820_s8, 1 }
  0x46   : > { %v220_v2 = vld [vmem:[%s166_s17 + $0x10] sm:$0x3]  ;;  %v221_v3 = vld [vmem:[%s166_s17 + $0x18] sm:$0x3]  ;;  %p205_p11 = scmp.lt.s32.totalorder %s829_s25, 2  ;;  %s194_s7 = scalar_lea.vmem [#allocation5], %s524_s6 }
  0x47   : > { %v231_v4 = vsel %vm230_vm0, %v220_v2, -inf  ;;  %v239_v6 = vsel %vm230_vm0, %v221_v3, -inf  ;;  %v864_v41 = vshrl.u32 %v227_v34, 7  ;;  %s413_s22 = scalar_lea.sflag [#allocation4], %s820_s8  ;;  %s421_s23 = ssub.s32 (%p758_p9), 3, %s829_s25 }
  0x48   : > { %v232_v5 = vmax.f32 %v218_v0, %v231_v4  ;;  %v240_v7 = vmax.f32 %v219_v1, %v239_v6  ;;  %s206_s19 = scalar_select %p205_p11, %s829_s25, 2  ;;  %v696_v4 = vmov 0.0  }
  0x49   : > { %v303_v48 = vsub.s32 0, %v864_v41  ;;  %v307_v51 = vsub.s32 1, %v864_v41  ;;  %v229_v57 = vadd.s32 8, %v864_v41  ;;  %p422_p6 = scmp.lt.s32.totalorder (%p758_p9), %s421_s23, 2 }
  0x4a   : > { %v233_v8 = vrot.slane %v232_v5, 4  ;;  %v241_v9 = vrot.slane %v240_v7, 4  ;;  %s207_s5 = scalar_lea.vmem %s946_s1, %s206_s19 }
  0x4b   : > { %v222_v18 = vld [vmem:[%s207_s5] sm:$0x3] }
  0x4c   : > { %v234_v10 = vmax.f32 %v232_v5, %v233_v8  ;;  %v242_v11 = vmax.f32 %v240_v7, %v241_v9  ;;  %vm223_vm1 = vcmp.gt.s32.totalorder %v222_v18, 0 }
  0x4d   : > { %v224_v29 = vsel %vm223_vm1, %v222_v18, 0 }
  0x4e   : > { %v235_v12 = vrot.slane %v234_v10, 2  ;;  %v243_v13 = vrot.slane %v242_v11, 2  ;;  %vm225_vm2 = vcmp.lt.s32.totalorder %v224_v29, 9 }
  0x4f   : > { %v226_v30 = vsel %vm225_vm2, %v224_v29, 9 }
  0x50   : > { %v236_v14 = vmax.f32 %v234_v10, %v235_v12  ;;  %v244_v15 = vmax.f32 %v242_v11, %v243_v13  ;;  %v526_v31 = vadd.s32 4294967295, %v226_v30  ;;  %v296_v38 = vadd.s32 1, %v226_v30 }
  0x51   : > { %v304_v56 = vrot.slane %v226_v30, %v303_v48  ;;  %v308_v59 = vrot.slane %v226_v30, %v307_v51 }
  0x52   : > { %v237_v16 = vrot.slane %v236_v14, 1  ;;  %v245_v17 = vrot.slane %v244_v15, 1  ;;  %vm292_vm3 = vcmp.gt.s32.totalorder %v526_v31, 0  ;;  %vm297_vm4 = vcmp.gt.s32.totalorder %v296_v38, 0 }
  0x53   : > { %v293_v44 = vsel %vm292_vm3, %v526_v31, 0  ;;  %v298_v50 = vsel %vm297_vm4, %v296_v38, 0  ;;  %vm309_vm7 = vcmp.eq.s32.totalorder %v864_v41, %v304_v56  ;;  %vm310_vm8 = vcmp.eq.s32.totalorder %v864_v41, %v308_v59 }
  0x54   : > { %v238_v19 = vmax.f32 %v236_v14, %v237_v16  ;;  %v246_v20 = vmax.f32 %v244_v15, %v245_v17  ;;  %vm294_vm5 = vcmp.lt.s32.totalorder %v293_v44, 9  ;;  %vm299_vm6 = vcmp.lt.s32.totalorder %v298_v50, 9 }
  0x55   : > { %v295_v54 = vsel %vm294_vm5, %v293_v44, 9  ;;  %v300_v63 = vsel %vm299_vm6, %v298_v50, 9  ;;  %vm311_vm9 = vcmp.eq.s32.totalorder %v229_v57, %v304_v56  ;;  %vm312_vm10 = vcmp.eq.s32.totalorder %v229_v57, %v308_v59 }
  0x56   : > { %v838_v21 = vsub.f32 %v218_v0, %v238_v19  ;;  %v840_v22 = vsub.f32 %v220_v2, %v238_v19  ;;  %v842_v23 = vsub.f32 %v219_v1, %v246_v20  ;;  %v844_v24 = vsub.f32 %v221_v3, %v246_v20 }
  0x57   : > { %v320_v61 = vrot.slane %v295_v54, %v303_v48  ;;  %v324_v0 = vrot.slane %v295_v54, %v307_v51  ;;  %v340_v2 = vrot.slane %v300_v63, %v303_v48  ;;  %v344_v3 = vrot.slane %v300_v63, %v307_v51 }
  0x58   : > { %v251_v25 = vmul.f32 1.442695, %v838_v21  ;;  %v255_v26 = vmul.f32 1.442695, %v840_v22  ;;  %v253_v27 = vmul.f32 1.442695, %v842_v23 }
  0x59   : > { %v257_v28 = vmul.f32 1.442695, %v844_v24  ;;  %vm325_vm11 = vcmp.eq.s32.totalorder %v864_v41, %v320_v61  ;;  %vm327_vm12 = vcmp.eq.s32.totalorder %v229_v57, %v320_v61  ;;  %vm326_vm13 = vcmp.eq.s32.totalorder %v864_v41, %v324_v0 }
  0x5a   : > { %581 = vpow2.f32 %v251_v25  ;;  %vm328_vm14 = vcmp.eq.s32.totalorder %v229_v57, %v324_v0  ;;  %v313_v5 = vsel %vm309_vm7, 0.9, %v696_v4  ;;  %v314_v6 = vsel %vm310_vm8, 0.9, %v696_v4 }
  0x5b   : > { %583 = vpow2.f32 %v253_v27  ;;  %v315_v7 = vsel %vm311_vm9, 0.9, %v696_v4  ;;  %v316_v8 = vsel %vm312_vm10, 0.9, %v696_v4  ;;  %v329_v9 = vsel %vm325_vm11, 0.05, %v696_v4 }
  0x5c   : > { %585 = vpow2.f32 %v255_v26  ;;  %v331_v10 = vsel %vm327_vm12, 0.05, %v696_v4  ;;  %v330_v11 = vsel %vm326_vm13, 0.05, %v696_v4  ;;  %v332_v12 = vsel %vm328_vm14, 0.05, %v696_v4 }
  0x5d   : > { %587 = vpow2.f32 %v257_v28  ;;  %vm345_vm15 = vcmp.eq.s32.totalorder %v864_v41, %v340_v2  ;;  %vm347_vm1 = vcmp.eq.s32.totalorder %v229_v57, %v340_v2  ;;  %vm346_vm2 = vcmp.eq.s32.totalorder %v864_v41, %v344_v3 }
  0x5e   : > { %vm348_vm3 = vcmp.eq.s32.totalorder %v229_v57, %v344_v3  ;;  %v333_v13 = vadd.f32 %v329_v9, %v313_v5  ;;  %v335_v14 = vadd.f32 %v331_v10, %v315_v7  ;;  %v334_v15 = vadd.f32 %v330_v11, %v314_v6 }
  0x5f   : > { %v336_v16 = vadd.f32 %v332_v12, %v316_v8  ;;  %v349_v17 = vsel %vm345_vm15, 0.05, %v696_v4  ;;  %v351_v18 = vsel %vm347_vm1, 0.05, %v696_v4  ;;  %v350_v19 = vsel %vm346_vm2, 0.05, %v696_v4 }
  0x60   : > { %v352_v20 = vsel %vm348_vm3, 0.05, %v696_v4  ;;  %v353_v28 = vadd.f32 %v349_v17, %v333_v13  ;;  %v355_v29 = vadd.f32 %v351_v18, %v335_v14 }
  0x61   : > { %v356_v38 = vadd.f32 %v352_v20, %v336_v16 }
  0x64   : > { %v850_v32 = vpop.eup %581 }
  0x65   : > { %v852_v33 = vpop.eup %583 }
  0x66   : > { %v854_v35 = vpop.eup %585 }
  0x67   : > { %v856_v36 = vpop.eup %587  ;;  %v259_v37 = vsel %vm230_vm0, %v854_v35, 0.0 }
  0x68   : > { %v260_v39 = vadd.f32 %v850_v32, %v259_v37  ;;  %v267_v40 = vsel %vm230_vm0, %v856_v36, 0.0  ;;  %v354_v37 = vadd.f32 %v350_v19, %v334_v15 }
  0x69   : > { %v268_v42 = vadd.f32 %v852_v33, %v267_v40 }
  0x6a   : > { %v261_v43 = vrot.slane %v260_v39, 4 }
  0x6b   : > { %v269_v45 = vrot.slane %v268_v42, 4 }
  0x6c   : > { %v262_v46 = vadd.f32 %v261_v43, %v260_v39 }
  0x6d   : > { %v270_v47 = vadd.f32 %v269_v45, %v268_v42 }
  0x6e   : > { %v263_v49 = vrot.slane %v262_v46, 2 }
  0x6f   : > { %v271_v52 = vrot.slane %v270_v47, 2 }
  0x70   : > { %v264_v53 = vadd.f32 %v263_v49, %v262_v46 }
  0x71   : > { %v272_v55 = vadd.f32 %v271_v52, %v270_v47 }
  0x72   : > { %v265_v58 = vrot.slane %v264_v53, 1 }
  0x73   : > { %v273_v60 = vrot.slane %v272_v55, 1 }
  0x74   : > { %v266_v62 = vadd.f32 %v265_v58, %v264_v53 }
  0x75   : > { %v274_v1 = vadd.f32 %v273_v60, %v272_v55 }
  0x76   : > { %589 = vlog2.f32 %v266_v62 }
  0x77   : > { %591 = vlog2.f32 %v274_v1 }
  0x78   : > { %593 = vrcp.f32 %v266_v62 }
  0x79   : > { %595 = vrcp.f32 %v274_v1  ;;  %v697_v1 = vmov 1966171168  }
  0x7a   : > { %v393_v2 = vunpack.c.l.s4 %v697_v1 }
  0x7c   : > { %v394_v7 = vunpack.c.0.s8 %v393_v2 }
  0x7e   : > { %v397_v12 = vsub.s32 %v394_v7, %v864_v41 }
  0x80   : > { %v590_v25 = vpop.eup %589 }
  0x81   : > { %v592_v26 = vpop.eup %591  ;;  %v276_v27 = vmul.f32 0.6931472, %v590_v25 }
  0x82   : > { %v594_v30 = vpop.eup %593  ;;  %v278_v31 = vmul.f32 0.6931472, %v592_v26 }
  0x83   : > { %v596_v39 = vpop.eup %595  ;;  %v279_v40 = vsub.f32 %v276_v27, %v838_v21  ;;  %v281_v42 = vsub.f32 %v276_v27, %v840_v22  ;;  %v287_v43 = vmul.f32 %v594_v30, %v850_v32  ;;  %v289_v44 = vmul.f32 %v594_v30, %v854_v35 }
  0x84   : > { %v280_v45 = vsub.f32 %v278_v31, %v842_v23  ;;  %v282_v46 = vsub.f32 %v278_v31, %v844_v24  ;;  %v288_v47 = vmul.f32 %v596_v39, %v852_v33  ;;  %v290_v48 = vmul.f32 %v596_v39, %v856_v36 }
  0x85   : > { %v357_v49 = vsub.f32 1.0, %v287_v43  ;;  %v359_v50 = vsub.f32 1.0, %v289_v44  ;;  %v365_v51 = vmul.f32 %v353_v28, %v279_v40  ;;  %v367_v52 = vmul.f32 %v355_v29, %v281_v42 }
  0x86   : > { %v358_v53 = vsub.f32 1.0, %v288_v47  ;;  %v360_v21 = vsub.f32 1.0, %v290_v48  ;;  %v366_v54 = vmul.f32 %v354_v37, %v280_v45  ;;  %v368_v22 = vmul.f32 %v356_v38, %v282_v46 }
  0x87   : > { %v361_v55 = vmul.f32 %v357_v49, %v357_v49  ;;  %v363_v32 = vmul.f32 %v359_v50, %v359_v50 }
  0x88   : > { %v362_v56 = vmul.f32 %v358_v53, %v358_v53  ;;  %v364_v35 = vmul.f32 %v360_v21, %v360_v21 }
  0x89   : > { %v369_v57 = vmul.f32 %v365_v51, %v361_v55  ;;  %v371_v23 = vmul.f32 %v367_v52, %v363_v32 }
  0x8a   : > { %v370_v58 = vmul.f32 %v366_v54, %v362_v56  ;;  %v372_v24 = vmul.f32 %v368_v22, %v364_v35 }
  0x8b   : > { %v373_v33 = vsel %vm230_vm0, %v371_v23, 0.0 }
  0x8c   : > { %v374_v59 = vadd.f32 %v373_v33, %v369_v57  ;;  %v381_v36 = vsel %vm230_vm0, %v372_v24, 0.0  ;;  %vm409_vm0 = vcmp.lt.s32.totalorder %v227_v34, 256 }
  0x8d   : > { %v382_v60 = vadd.f32 %v381_v36, %v370_v58 }
  0x8e   : > { %v375_v61 = vrot.slane %v374_v59, 4 }
  0x8f   : > { %v383_v62 = vrot.slane %v382_v60, 4 }
  0x90   : > { %v376_v63 = vadd.f32 %v375_v61, %v374_v59 }
  0x91   : > { %v384_v0 = vadd.f32 %v383_v62, %v382_v60 }
  0x92   : > { %v377_v3 = vrot.slane %v376_v63, 2 }
  0x93   : > { %v385_v4 = vrot.slane %v384_v0, 2 }
  0x94   : > { %v378_v5 = vadd.f32 %v377_v3, %v376_v63 }
  0x95   : > { %v386_v6 = vadd.f32 %v385_v4, %v384_v0 }
  0x96   : > { %v379_v8 = vrot.slane %v378_v5, 1 }
  0x97   : > { %v387_v9 = vrot.slane %v386_v6, 1 }
  0x98   : > { %v380_v10 = vadd.f32 %v379_v8, %v378_v5 }
  0x99   : > { %v388_v11 = vadd.f32 %v387_v9, %v386_v6 }
  0x9b   : > { %v391_v13 = vcombine.low %v380_v10, %v388_v11  ;;  %419 = sbr.rel (!%p758_p9) target bundleno = 189 (0xbd), region = 36 }
  0x9d   : > { %v398_v14 = vrot.slane %v391_v13, %v397_v12 }
  0x9f   : > { %v405_v15 = vrot.slane %v398_v14, %v397_v12 }
  0xa1   : > { %411 = vst.msk [vmem:[%s194_s7] sm:$0x3] %vm409_vm0, %v405_v15 }
  0xa2   : > { %s961_s23 = smov (!%p422_p6, %s421_s23), 2 }
  0xa3   : > { %s893_s24 = sshll.u32 %s961_s23, 4 }
  0xa4   : > { %s426_s27 = ssub.s32 32, %s893_s24 }
  0xa5   : > { %427 = vsyncadd %s413_s22, %s426_s27  ;;  %p530_p13 = scmp.ne.s32.totalorder %s893_s24, 0  ;;  %s537_s29 = sshll.u32 %s735_s13, 5 }
  0xa6   : > { %s903_s3 = scalar_lea.hbm %s947_s2, %s537_s29  ;;  %s432_s4 = sshll.u32 %s194_s7, 4  ;;  %s433_s4 = int_to_ptr.vmem [resolvable:$true] %s432_s4 }
  0xa7   : > { %s625_s14 = scalar_lea.vmem %s433_s4, %s893_s24  ;;  %s698_s16 = smov [#allocation5]  }
  0xa8   : > { %p626_p9 = scmp.ne.s32.totalorder %s433_s4, %s625_s14  ;;  %s629_s17 = sshll.u32 %s698_s16, 4  ;;  %s630_s17 = int_to_ptr.vmem [resolvable:$false] %s629_s17 }
  0xa9   : > { %s631_s25 = scalar_lea.vmem %s630_s17, 64  ;;  %p632_p0 = scmp.lt.s32.totalorder %s433_s4, %s630_s17 }
  0xaa   : > { %p627_p8 = pnand %p626_p9, %p530_p13  ;;  %p633_p1 = scmp.lt.s32.totalorder %s631_s25, %s625_s14 }
  0xac   : > { %p628_p12 = pneg %p627_p8  ;;  %p634_p3 = por %p633_p1, %p632_p0 }
  0xae   : > { %p635_p4 = pnand %p634_p3, %p628_p12 }
  0xb0   : > { %638 = shalt.err (!%p635_p4)
}
  0xb1   : > { %s639_s13 = scalar_lea.hbm %s903_s3, %s893_s24  ;;  %s643_s28 = scalar_lea.hbm %s947_s2, 48 }
  0xb2   : > { %p640_p5 = scmp.ne.s32.totalorder %s903_s3, %s639_s13  ;;  %p644_p10 = scmp.lt.u32.totalorder %s903_s3, %s947_s2 }
  0xb3   : > { %p645_p11 = scmp.lt.u32.totalorder %s643_s28, %s639_s13  ;;  %p647_p9 = scmp.lt.u32.totalorder %s639_s13, %s903_s3 }
  0xb4   : > { %p641_p2 = pnand %p640_p5, %p530_p13 }
  0xb5   : > { %p646_p6 = por %p645_p11, %p644_p10 }
  0xb6   : > { %p642_p7 = pneg %p641_p2 }
  0xb7   : > { %p648_p8 = por %p647_p9, %p646_p6 }
  0xb9   : > { %p649_p12 = pnand %p648_p8, %p642_p7 }
  0xbb   : > { %652 = shalt.err (!%p649_p12)
}
  0xbc   : > { %435 = dma.vmem_to_hbm [thread:$0]  (%p530_p13), %s433_s4, %s893_s24, %s903_s3, %s413_s22  }
  0xbd PF: > { %s444_s7 = sand.u32 1, %s679_s9   ;;  %p952_p0 = scmp.ne.s32.totalorder %s951_s21, 0 }
  0xbe   : > { %p953_p1 = scmp.ge.s32.totalorder %s691_s12, 2  ;;  %s445_s23 = scalar_lea.sflag [#allocation4], %s444_s7 }
  0xc0   : > { %p541_p3 = pnand %p953_p1, %p952_p0 }
  0xc2   : > { %674 = dma.done.wait (!%p541_p3), %s445_s23, 32  }
  0xc3   : > { %676 = vsyncadd (!%p541_p3), %s445_s23, 4294967264  ;;  %p15_p4 = scmp.ge.s32.totalorder %s739_s15, 4   ;;  %s954_s9 = smov %s683_s10 }
  0xc4   : > { %s955_s10 = smov %s687_s11  ;;  %s956_s11 = smov %s751_s18 }
  0xc5   : > { %s957_s12 = smov %s739_s15  ;;  %17 = sbr.rel (!%p15_p4) target bundleno = 5 (0x5), region = 76 }
  0xcc   :  { %450 = vsyncpa [#allocation3], 1 }
  0xcd   :  { %452 = vsyncpa [#allocation3 + $0x1], 1 }
  0xce   :  { %453 = vsyncpa [#allocation4], 1 }
  0xcf   :  { %455 = vsyncpa [#allocation4 + $0x1], 1 }

</bundles_post_ra>
